<compile_context>
chip_gen: v6e
topology: v6e:2x2x1
jax: 0.10.0
libtpu: 0.0.40
codegen_flags: <defaults>
</compile_context>

<pallas_src>
import functools

import jax
import jax.numpy as jnp
from jax.experimental import pallas as pl
from jax.experimental.pallas import tpu as pltpu


def _round_up(v, m):
    return (v + m - 1) // m * m


def _vmem_limit_bytes():
    """Pick a scoped-VMEM limit with headroom, based on the chip's capacity."""
    cap = 64 * 1024 * 1024  # conservative fallback (v7x per-TC VMEM)
    try:
        info = pltpu.get_tpu_info()
        cap = int(getattr(info, "vmem_capacity_bytes", cap))
    except Exception:
        pass
    # ~75% of physical, capped at 96 MiB (128 MiB chips) -> 48 MiB on v7x.
    return min(cap * 3 // 4, 96 * 1024 * 1024)


def _choose_tiles(n):
    """Return (NP, tm, tk): padded node count, row tile, reduction tile."""
    big = 2048  # int8 A tile: 4 MiB, double-buffered 8 MiB -> fits all gens
    if n >= big:
        np_ = _round_up(n, big)
        tk = big
        # Keep >= 2 row tiles so the "parallel" axis can use both v7x TCs.
        tm = big if np_ // big >= 2 else big // 2
    else:
        np_ = _round_up(max(n, 8), 128)
        tk = np_
        tm = np_ // 2  # NP is a multiple of 128 -> NP//2 is 8-aligned, >= 64
    return np_, tm, tk


def _sage_layer_kernel(a_ref, xk_ref, xi_ref, invd_ref, wl_ref, wr_ref, b_ref,
                       o_ref, *acc_scratch, apply_relu):
    """One SAGEConv layer: out = lin_l(mean_agg(x)) + b + lin_r(x) [+ relu].

    If no scratch is supplied (f32 output layer), the resident output block is
    used as the accumulator directly.
    """
    acc_ref = acc_scratch[0] if acc_scratch else o_ref
    k = pl.program_id(1)

    @pl.when(k == 0)
    def _():
        acc_ref[...] = jnp.zeros_like(acc_ref)

    # A is stored as int8 edge counts (1 byte/elem of HBM); cast to the
    # activation dtype on the fly and accumulate in f32 on the MXU.
    acc_ref[...] += jnp.dot(a_ref[...].astype(xk_ref.dtype), xk_ref[...],
                            preferred_element_type=jnp.float32)

    @pl.when(k == pl.num_programs(1) - 1)
    def _():
        # Fused mean normalization: per-row 1/deg applied here instead of
        # materializing a normalized NP^2 adjacency in HBM.
        agg = acc_ref[...] * invd_ref[...]                       # (tm, FP) f32
        out = (jnp.dot(agg.astype(wl_ref.dtype), wl_ref[...],
                       preferred_element_type=jnp.float32)
               + b_ref[...]
               + jnp.dot(xi_ref[...], wr_ref[...],
                         preferred_element_type=jnp.float32))
        if apply_relu:
            out = jnp.maximum(out, 0.0)
        o_ref[...] = out.astype(o_ref.dtype)


def _sage_layer(a, inv_deg, x, wl, wr, b, *, apply_relu, out_dtype, tm, tk):
    """Run one SAGEConv layer with A tiled over a (rows, reduction) grid."""
    NP, FP = x.shape
    grid = (NP // tm, NP // tk)
    n_row_tiles = grid[0]
    out_dtype = jnp.dtype(out_dtype)

    # f32 output -> accumulate straight into the resident output block.
    use_scratch = out_dtype != jnp.float32
    scratch_shapes = [pltpu.VMEM((tm, FP), jnp.float32)] if use_scratch else []

    flops = 2 * NP * NP * FP + 2 * (2 * NP * FP * FP)
    x_bytes = x.size * x.dtype.itemsize
    bytes_accessed = (a.size * a.dtype.itemsize          # A streamed once
                      + n_row_tiles * x_bytes            # X col tiles replayed
                      + x_bytes                          # X self row tiles
                      + inv_deg.size * 4
                      + (wl.size + wr.size) * wl.dtype.itemsize
                      + b.size * 4
                      + NP * FP * out_dtype.itemsize)

    kernel = functools.partial(_sage_layer_kernel, apply_relu=apply_relu)

    return pl.pallas_call(
        kernel,
        out_shape=jax.ShapeDtypeStruct((NP, FP), out_dtype),
        grid_spec=pltpu.PrefetchScalarGridSpec(
            num_scalar_prefetch=0,
            grid=grid,
            in_specs=[
                pl.BlockSpec((tm, tk), lambda i, k: (i, k)),   # A: streamed
                pl.BlockSpec((tk, FP), lambda i, k: (k, 0)),   # X col tile (agg)
                pl.BlockSpec((tm, FP), lambda i, k: (i, 0)),   # X row tile (self)
                pl.BlockSpec((tm, 1), lambda i, k: (i, 0)),    # 1/deg (resident)
                pl.BlockSpec((FP, FP), lambda i, k: (0, 0)),   # W_l (resident)
                pl.BlockSpec((FP, FP), lambda i, k: (0, 0)),   # W_r (resident)
                pl.BlockSpec((1, FP), lambda i, k: (0, 0)),    # bias (resident)
            ],
            out_specs=pl.BlockSpec((tm, FP), lambda i, k: (i, 0)),
            scratch_shapes=scratch_shapes,
        ),
        compiler_params=pltpu.CompilerParams(
            dimension_semantics=("parallel", "arbitrary"),
            vmem_limit_bytes=_vmem_limit_bytes(),
        ),
        cost_estimate=pl.CostEstimate(
            flops=flops, transcendentals=0, bytes_accessed=bytes_accessed),
    )(a, x, x, inv_deg, wl, wr, b)


def gnn_forward(x, edge_index, params, *, compute_dtype=jnp.bfloat16):
    """x: (N, F) float32, edge_index: (2, E) int32, params: tuple of weights."""
    N, F = x.shape
    FP = _round_up(F, 128)
    NP, tm, tk = _choose_tiles(N)

    src, dst = edge_index[0], edge_index[1]

    # Dense edge-count adjacency built directly in 1-byte storage:
    # A[i, j] = #edges j->i (exact for multiplicity <= 127).  Degree comes
    # straight from the edge list, so no NP^2 f32 intermediate / row-sum pass.
    a = jnp.zeros((NP, NP), jnp.int8).at[dst, src].add(1)
    deg = jnp.zeros((NP,), jnp.float32).at[dst].add(1.0)
    inv_deg = (1.0 / jnp.maximum(deg, 1.0)).reshape(NP, 1)    # (NP, 1) f32

    w1l, w1r, b1, w2l, w2r, b2 = params

    def pad_mat(w):
        return (jnp.zeros((FP, FP), jnp.float32).at[:F, :F].set(w)
                .astype(compute_dtype))

    def pad_bias(bv):
        return jnp.zeros((1, FP), jnp.float32).at[0, :F].set(bv)

    xp = (jnp.zeros((NP, FP), jnp.float32).at[:N, :F].set(x)
          .astype(compute_dtype))

    h1 = _sage_layer(a, inv_deg, xp, pad_mat(w1l), pad_mat(w1r), pad_bias(b1),
                     apply_relu=True, out_dtype=compute_dtype, tm=tm, tk=tk)
    out = _sage_layer(a, inv_deg, h1, pad_mat(w2l), pad_mat(w2r), pad_bias(b2),
                      apply_relu=False, out_dtype=jnp.float32, tm=tm, tk=tk)
    return out[:N, :F]


def gnn_reference(x, edge_index, params):
    """Plain-JAX f32 reference (PyG SAGEConv mean-aggregation semantics)."""
    N, _ = x.shape
    src, dst = edge_index[0], edge_index[1]
    a = jnp.zeros((N, N), jnp.float32).at[dst, src].add(1.0)
    deg = jnp.sum(a, axis=1, keepdims=True)
    a_norm = a / jnp.maximum(deg, 1.0)
    w1l, w1r, b1, w2l, w2r, b2 = params
    h = jnp.maximum((a_norm @ x) @ w1l + b1 + x @ w1r, 0.0)
    return (a_norm @ h) @ w2l + b2 + h @ w2r


def init_params(key, hidden):
    """Deterministic synthetic init (uniform, Linear-style scale)."""
    ks = jax.random.split(key, 6)
    scale = 1.0 / jnp.sqrt(jnp.float32(hidden))
    u = lambda k, shape: jax.random.uniform(k, shape, jnp.float32, -scale, scale)
    w1l = u(ks[0], (hidden, hidden))   # conv1.lin_l.weight
    w1r = u(ks[1], (hidden, hidden))   # conv1.lin_r.weight (no bias in PyG)
    b1 = u(ks[2], (hidden,))           # conv1.lin_l.bias
    w2l = u(ks[3], (hidden, hidden))   # conv2.lin_l.weight
    w2r = u(ks[4], (hidden, hidden))   # conv2.lin_r.weight
    b2 = u(ks[5], (hidden,))           # conv2.lin_l.bias
    return (w1l, w1r, b1, w2l, w2r, b2)


if __name__ == "__main__":
    key = jax.random.PRNGKey(0)
    N, HIDDEN, E = 16, 32, 48

    k_x, k_src, k_dst, k_w = jax.random.split(key, 4)
    x = jax.random.normal(k_x, (N, HIDDEN), jnp.float32)
    src = jax.random.randint(k_src, (E,), 0, N, dtype=jnp.int32)
    dst = jax.random.randint(k_dst, (E,), 0, N, dtype=jnp.int32)
    edge_index = jnp.stack([src, dst], axis=0)  # (2, E), row0=src, row1=dst

    params = init_params(k_w, HIDDEN)

    out = gnn_forward(x, edge_index, params)
    jax.block_until_ready(out)
    assert out.shape == (N, HIDDEN) and out.dtype == jnp.float32

    ref = gnn_reference(x, edge_index, params)
    max_err = float(jnp.max(jnp.abs(out - ref)))
    assert max_err < 0.1, f"max abs error vs f32 reference: {max_err}"

    print("KERNEL_OK")
</pallas_src>

<mosaic_0001>
module attributes {stable_mosaic.version = 11 : i64} {
  func.func @_sage_layer_kernel(%arg0: i32, %arg1: i32, %arg2: memref<64x128xi8, #tpu.memory_space<vmem>>, %arg3: memref<128x128xbf16, #tpu.memory_space<vmem>>, %arg4: memref<64x128xbf16, #tpu.memory_space<vmem>>, %arg5: memref<64x1xf32, #tpu.memory_space<vmem>>, %arg6: memref<128x128xbf16, #tpu.memory_space<vmem>>, %arg7: memref<128x128xbf16, #tpu.memory_space<vmem>>, %arg8: memref<1x128xf32, #tpu.memory_space<vmem>>, %arg9: memref<64x128xbf16, #tpu.memory_space<vmem>>, %arg10: memref<64x128xf32, #tpu.memory_space<vmem>>) attributes {dimension_semantics = [#tpu.dimension_semantics<parallel>, #tpu.dimension_semantics<arbitrary>], iteration_bounds = array<i64: 2, 1>, scalar_prefetch = 0 : i64, scratch_operands = 1 : i64, tpu.core_type = #tpu.core_type<tc>, window_params = [{transform_indices = @transform_0, window_bounds = array<i64: 64, 128>}, {transform_indices = @transform_1, window_bounds = array<i64: 128, 128>}, {transform_indices = @transform_2, window_bounds = array<i64: 64, 128>}, {transform_indices = @transform_3, window_bounds = array<i64: 64, 1>}, {pipeline_mode = #tpu.pipeline_mode<synchronous>, transform_indices = @transform_4, window_bounds = array<i64: 128, 128>}, {pipeline_mode = #tpu.pipeline_mode<synchronous>, transform_indices = @transform_5, window_bounds = array<i64: 128, 128>}, {pipeline_mode = #tpu.pipeline_mode<synchronous>, transform_indices = @transform_6, window_bounds = array<i64: 1, 128>}, {transform_indices = @transform_7, window_bounds = array<i64: 64, 128>}]} {
    %c0_i32 = arith.constant 0 : i32
    %0 = arith.cmpi eq, %arg1, %c0_i32 : i32
    %1 = arith.extui %0 : i1 to i32
    %c0_i32_0 = arith.constant 0 : i32
    %2 = arith.cmpi ne, %1, %c0_i32_0 : i32
    scf.if %2 {
      %cst_10 = arith.constant 0.000000e+00 : f32
      %13 = vector.broadcast %cst_10 : f32 to vector<64x128xf32>
      %c0_11 = arith.constant 0 : index
      %c0_12 = arith.constant 0 : index
      %14 = vector.load %arg10[%c0_11, %c0_12] : memref<64x128xf32, #tpu.memory_space<vmem>>, vector<64x128xf32>
      tpu.vector_store %arg10[%c0_11, %c0_12], %13 {strides = array<i32>} : memref<64x128xf32, #tpu.memory_space<vmem>>, vector<64x128xf32>,
    } else {
    }
    %c0 = arith.constant 0 : index
    %c0_1 = arith.constant 0 : index
    %3 = vector.load %arg10[%c0, %c0_1] : memref<64x128xf32, #tpu.memory_space<vmem>>, vector<64x128xf32>
    %c0_2 = arith.constant 0 : index
    %c0_3 = arith.constant 0 : index
    %4 = vector.load %arg2[%c0_2, %c0_3] : memref<64x128xi8, #tpu.memory_space<vmem>>, vector<64x128xi8>
    %5 = arith.sitofp %4 : vector<64x128xi8> to vector<64x128xbf16>
    %c0_4 = arith.constant 0 : index
    %c0_5 = arith.constant 0 : index
    %6 = vector.load %arg3[%c0_4, %c0_5] : memref<128x128xbf16, #tpu.memory_space<vmem>>, vector<128x128xbf16>
    %cst = arith.constant dense<0.000000e+00> : vector<64x128xf32>
    %7 = tpu.matmul %5, %6, %cst {dimension_numbers = #tpu.dot_dimension_numbers<[1], [0], [0], [1], [0, 0, 1, 1], [], []>} : vector<64x128xbf16>, vector<128x128xbf16>, vector<64x128xf32> -> vector<64x128xf32>
    %8 = arith.addf %3, %7 : vector<64x128xf32>
    %c0_6 = arith.constant 0 : index
    %c0_7 = arith.constant 0 : index
    %9 = vector.load %arg10[%c0_6, %c0_7] : memref<64x128xf32, #tpu.memory_space<vmem>>, vector<64x128xf32>
    tpu.vector_store %arg10[%c0_6, %c0_7], %8 {strides = array<i32>} : memref<64x128xf32, #tpu.memory_space<vmem>>, vector<64x128xf32>,
    %c0_i32_8 = arith.constant 0 : i32
    %10 = arith.cmpi eq, %arg1, %c0_i32_8 : i32
    %11 = arith.extui %10 : i1 to i32
    %c0_i32_9 = arith.constant 0 : i32
    %12 = arith.cmpi ne, %11, %c0_i32_9 : i32
    scf.if %12 {
      %c0_10 = arith.constant 0 : index
      %c0_11 = arith.constant 0 : index
      %13 = vector.load %arg10[%c0_10, %c0_11] : memref<64x128xf32, #tpu.memory_space<vmem>>, vector<64x128xf32>
      %c0_12 = arith.constant 0 : index
      %c0_13 = arith.constant 0 : index
      %14 = vector.load %arg5[%c0_12, %c0_13] : memref<64x1xf32, #tpu.memory_space<vmem>>, vector<64x1xf32>
      %15 = vector.broadcast %14 : vector<64x1xf32> to vector<64x128xf32>
      %16 = arith.mulf %13, %15 : vector<64x128xf32>
      %17 = arith.truncf %16 : vector<64x128xf32> to vector<64x128xbf16>
      %c0_14 = arith.constant 0 : index
      %c0_15 = arith.constant 0 : index
      %18 = vector.load %arg6[%c0_14, %c0_15] : memref<128x128xbf16, #tpu.memory_space<vmem>>, vector<128x128xbf16>
      %cst_16 = arith.constant dense<0.000000e+00> : vector<64x128xf32>
      %19 = tpu.matmul %17, %18, %cst_16 {dimension_numbers = #tpu.dot_dimension_numbers<[1], [0], [0], [1], [0, 0, 1, 1], [], []>} : vector<64x128xbf16>, vector<128x128xbf16>, vector<64x128xf32> -> vector<64x128xf32>
      %c0_17 = arith.constant 0 : index
      %c0_18 = arith.constant 0 : index
      %20 = vector.load %arg8[%c0_17, %c0_18] : memref<1x128xf32, #tpu.memory_space<vmem>>, vector<1x128xf32>
      %21 = vector.broadcast %20 : vector<1x128xf32> to vector<64x128xf32>
      %22 = arith.addf %19, %21 : vector<64x128xf32>
      %c0_19 = arith.constant 0 : index
      %c0_20 = arith.constant 0 : index
      %23 = vector.load %arg4[%c0_19, %c0_20] : memref<64x128xbf16, #tpu.memory_space<vmem>>, vector<64x128xbf16>
      %c0_21 = arith.constant 0 : index
      %c0_22 = arith.constant 0 : index
      %24 = vector.load %arg7[%c0_21, %c0_22] : memref<128x128xbf16, #tpu.memory_space<vmem>>, vector<128x128xbf16>
      %cst_23 = arith.constant dense<0.000000e+00> : vector<64x128xf32>
      %25 = tpu.matmul %23, %24, %cst_23 {dimension_numbers = #tpu.dot_dimension_numbers<[1], [0], [0], [1], [0, 0, 1, 1], [], []>} : vector<64x128xbf16>, vector<128x128xbf16>, vector<64x128xf32> -> vector<64x128xf32>
      %26 = arith.addf %22, %25 : vector<64x128xf32>
      %cst_24 = arith.constant 0.000000e+00 : f32
      %27 = vector.broadcast %cst_24 : f32 to vector<64x128xf32>
      %28 = arith.maximumf %26, %27 : vector<64x128xf32>
      %29 = arith.truncf %28 : vector<64x128xf32> to vector<64x128xbf16>
      %c0_25 = arith.constant 0 : index
      %c0_26 = arith.constant 0 : index
      %30 = vector.load %arg9[%c0_25, %c0_26] : memref<64x128xbf16, #tpu.memory_space<vmem>>, vector<64x128xbf16>
      tpu.vector_store %arg9[%c0_25, %c0_26], %29 {strides = array<i32>} : memref<64x128xbf16, #tpu.memory_space<vmem>>, vector<64x128xbf16>,
    } else {
    }
    return
  }
  func.func @transform_0(%arg0: i32, %arg1: i32) -> (i32, i32) {
    %c0_i32 = arith.constant 0 : i32
    return %arg0, %arg1 : i32, i32
  }
  func.func @transform_1(%arg0: i32, %arg1: i32) -> (i32, i32) {
    %c0_i32 = arith.constant 0 : i32
    %c0_i32_0 = arith.constant 0 : i32
    return %arg1, %c0_i32 : i32, i32
  }
  func.func @transform_2(%arg0: i32, %arg1: i32) -> (i32, i32) {
    %c0_i32 = arith.constant 0 : i32
    %c0_i32_0 = arith.constant 0 : i32
    return %arg0, %c0_i32 : i32, i32
  }
  func.func @transform_3(%arg0: i32, %arg1: i32) -> (i32, i32) {
    %c0_i32 = arith.constant 0 : i32
    %c0_i32_0 = arith.constant 0 : i32
    return %arg0, %c0_i32 : i32, i32
  }
  func.func @transform_4(%arg0: i32, %arg1: i32) -> (i32, i32) {
    %c0_i32 = arith.constant 0 : i32
    %c0_i32_0 = arith.constant 0 : i32
    %c0_i32_1 = arith.constant 0 : i32
    return %c0_i32, %c0_i32_0 : i32, i32
  }
  func.func @transform_5(%arg0: i32, %arg1: i32) -> (i32, i32) {
    %c0_i32 = arith.constant 0 : i32
    %c0_i32_0 = arith.constant 0 : i32
    %c0_i32_1 = arith.constant 0 : i32
    return %c0_i32, %c0_i32_0 : i32, i32
  }
  func.func @transform_6(%arg0: i32, %arg1: i32) -> (i32, i32) {
    %c0_i32 = arith.constant 0 : i32
    %c0_i32_0 = arith.constant 0 : i32
    %c0_i32_1 = arith.constant 0 : i32
    return %c0_i32, %c0_i32_0 : i32, i32
  }
  func.func @transform_7(%arg0: i32, %arg1: i32) -> (i32, i32) {
    %c0_i32 = arith.constant 0 : i32
    %c0_i32_0 = arith.constant 0 : i32
    return %arg0, %c0_i32 : i32, i32
  }
}

</mosaic_0001>

<bundles_post_ra>
// kernel: tpu_custom_call.1
= control target key start
LH: loop header
LB: loop body
LE: loop exit
PB: predicated region body
PF: predicated region fallthrough
CT: control target
= control target key end

     0   :  { %s2005_s0 = inlined_call_operand.hbm [shape: s8[128,128], index: 0, kind: input, shape index: {}]   ;;  %s2006_s1 = inlined_call_operand.vmem [shape: bf16[128,128], index: 1, kind: input, shape index: {}]   ;;  %s2007_s2 = inlined_call_operand.vmem [shape: bf16[128,128], index: 2, kind: input, shape index: {}]   ;;  %s2008_s3 = inlined_call_operand.vmem [shape: f32[128,1], index: 3, kind: input, shape index: {}]   ;;  %s2009_s4 = inlined_call_operand.hbm [shape: bf16[128,128], index: 4, kind: input, shape index: {}]   ;;  %s2010_s5 = inlined_call_operand.hbm [shape: bf16[128,128], index: 5, kind: input, shape index: {}]   ;;  %s2011_s6 = inlined_call_operand.vmem [shape: f32[1,128], index: 6, kind: input, shape index: {}]   ;;  %s2012_s7 = inlined_call_operand.hbm [shape: bf16[128,128], index: 7, kind: output, shape index: {}]  }
   0x1   :  { %2017 = sst [smem:[#allocation14_spill]] %s2009_s4 }
   0x2   :  { %2018 = sst [smem:[#allocation15_spill]] %s2010_s5 }
   0x3   :  { %12 = vsyncpa [#allocation4], 0 }
   0x4   :  { %14 = vsyncpa [#allocation4 + $0x1], 0 }
   0x5   :  { %15 = vsyncpa [#allocation7], 0 }
   0x6   :  { %16 = vsyncpa [#allocation5], 0 }
   0x7   :  { %18 = vsyncpa [#allocation5 + $0x1], 0  ;;  %s1715_s24 = smov 0   ;;  %s1717_s25 = smov 0  }
   0x8   :  { %s1719_s26 = smov 0   ;;  %s1721_s27 = smov 0  }
   0x9   :  { %s1723_s28 = smov 0   ;;  %s1725_s29 = smov 0  }
   0xa LB: > { %s1160_s30 = sadd.s32 4294967295, %s1662_s29   ;;  %s1161_s8 = sadd.s32 4294967294, %s1662_s29   ;;  %s1662_s29 = sphi %s1725_s29, %s24_s29   ;;  %s1658_s28 = sphi %s1723_s28, %s2039_s28   ;;  %s1654_s27 = sphi %s1721_s27, %s2038_s27   ;;  %s1650_s26 = sphi %s1719_s26, %s2037_s26   ;;  %s1646_s25 = sphi %s1717_s25, %s2036_s25   ;;  %s1642_s24 = sphi %s1715_s24, %s2035_s24  }
   0xb   : > { %p58_p0 = scmp.ne.s32.totalorder %s1646_s25, %s1642_s24  ;;  %p1749_p1 = scmp.eq.s32.totalorder %s1160_s30, 0 }
   0xc   : > { %p1753_p2 = scmp.eq.s32.totalorder %s1160_s30, 1  ;;  %p229_p3 = scmp.eq.s32.totalorder %s1161_s8, 1 }
   0xd   : > { %s2019_s9 = scalar_select %p1749_p1, 1, 0 }
   0xe   : > { %p1759_p4 = por %p1749_p1, %p58_p0  ;;  %p1162_p5 = scmp.ge.s32.totalorder %s1662_s29, 1 }
   0xf   : > { %p1764_p6 = por %p229_p3, %p58_p0  ;;  %p236_p7 = scmp.lt.s32.totalorder %s1662_s29, 3 }
  0x10   : > { %s2021_s11 = scalar_select %p1759_p4, 1, 0 }
  0x11   : > { %s2022_s12 = scalar_select %p1764_p6, 1, 0 }
  0x12   : > { %p1769_p8 = pnand %p1162_p5, %p236_p7  ;;  %s1664_s14 = smov [#allocation6]  }
  0x13   : > { %s257_s15 = sshll.u32 %s1664_s14, 4  ;;  %s1665_s17 = smov [#allocation8]   ;;  %s258_s15 = int_to_ptr.vmem [resolvable:$true] %s257_s15 }
  0x14   : > { %p1390_p9 = pneg %p1769_p8  ;;  %s270_s18 = sshll.u32 %s1665_s17, 4  ;;  %s271_s18 = int_to_ptr.vmem [resolvable:$true] %s270_s18 }
  0x15   : > { %s1509_s19 = scalar_lea.vmem %s258_s15, 1024  ;;  %p1517_p5 = scmp.lt.s32.totalorder %s258_s15, %s258_s15 }
  0x16   : > { %p1778_p11 = pnand %p1390_p9, %p1749_p1  ;;  %p1510_p13 = scmp.ne.s32.totalorder %s258_s15, %s1509_s19 }
  0x17   : > { %p1518_p7 = scmp.lt.s32.totalorder %s1509_s19, %s1509_s19 }
  0x18   : > { %p1500_p12 = pneg %p1778_p11 }
  0x19   : > { %p1519_p10 = por %p1518_p7, %p1517_p5 }
  0x1a   : > { %p1512_p0 = pnand %p1510_p13, %p1500_p12 }
  0x1c   : > { %p1513_p3 = pneg %p1512_p0 }
  0x1e   : > { %p1520_p9 = pnand %p1519_p10, %p1513_p3 }
  0x20   : > { %1523 = shalt.err (!%p1520_p9)
}
  0x21   : > { %s1666_s20 = smov 64   ;;  %s1667_s21 = smov 4  }
  0x22   : > { %s2025_s4 = sld [smem:[#allocation14_spill]]  ;;  %s1535_s30 = scalar_lea.vmem %s271_s18, 1024 }
  0x23   : > { %p1536_p6 = scmp.ne.s32.totalorder %s271_s18, %s1535_s30  ;;  %p1543_p1 = scmp.lt.s32.totalorder %s271_s18, %s271_s18 }
  0x24   : > { %p1544_p4 = scmp.lt.s32.totalorder %s1535_s30, %s1535_s30 }
  0x25   : > { %p1538_p13 = pnand %p1536_p6, %p1500_p12 }
  0x26   : > { %p1545_p5 = por %p1544_p4, %p1543_p1 }
  0x27   : > { %p1539_p0 = pneg %p1538_p13 }
  0x28   : > { %1393 = dma.hbm_to_vmem [thread:$0]  (!%p1778_p11), %s2025_s4, 1024, %s258_s15, [#allocation7], %s1666_s20, %s1666_s20, %s1667_s21  }
  0x29   : > { %p1546_p10 = pnand %p1545_p5, %p1539_p0 }
  0x2b   : > { %1549 = shalt.err (!%p1546_p10)
}
  0x2c   : > { %s2026_s5 = sld [smem:[#allocation15_spill]]  ;;  %s36_s15 = sadd.s32 1, %s1658_s28 }
  0x2d   : > { %s45_s17 = sadd.s32 1, %s1650_s26  ;;  %p38_p1 = scmp.ge.s32.totalorder %s36_s15, 2 }
  0x2e   : > { %p52_p4 = scmp.ne.s32.totalorder %s1650_s26, %s1646_s25  ;;  %p53_p6 = scmp.eq.s32.totalorder %s1662_s29, 0 }
  0x2f   : > { %p1407_p12 = scmp.lt.s32.totalorder %s1662_s29, 2  ;;  %s2041_s15 = smov (%p38_p1, %s36_s15), 0 }
  0x30   : > { %2027 = sst [smem:[#allocation13_spill]] %s2041_s15  ;;  %p54_p3 = por %p53_p6, %p52_p4 }
  0x31   : > { %p1810_p7 = por %p1753_p2, %p52_p4  ;;  %s40_s19 = ssub.s32 %s1658_s28, %s2041_s15 }
  0x32   : > { %1396 = dma.hbm_to_vmem [thread:$0]  (!%p1778_p11), %s2026_s5, 1024, %s271_s18, [#allocation7], %s1666_s20, %s1666_s20, %s1667_s21  }
  0x33   : > { %s287_s22 = sand.u32 1, %s1650_s26   ;;  %p43_p9 = scmp.eq.s32.totalorder %s40_s19, 0 }
  0x34   : > { %s1167_s18 = sshll.u32 %s287_s22, 4  ;;  %s1221_s20 = sshll.u32 %s1658_s28, 8 }
  0x35   : > { %s1819_s21 = scalar_select %p43_p9, %s1650_s26, %s45_s17  }
  0x36   : > { %s298_s8 = scalar_lea.hbm %s2005_s0, %s1221_s20  ;;  %s291_s14 = scalar_lea.vmem [#allocation3], %s1167_s18 }
  0x37   : > { %s299_s4 = sshll.u32 %s291_s14, 4  ;;  %p1826_p11 = pnand %p1407_p12, %p54_p3  ;;  %s300_s4 = int_to_ptr.vmem [resolvable:$true] %s299_s4 }
  0x38   : > { %s288_s5 = scalar_lea.sflag [#allocation4], %s287_s22  ;;  %s1563_s19 = scalar_lea.vmem %s300_s4, 256 }
  0x39   : > { %p1552_p2 = pneg %p1826_p11  ;;  %p1564_p13 = scmp.ne.s32.totalorder %s300_s4, %s1563_s19 }
  0x3a   : > { %s1668_s17 = smov [#allocation3]  }
  0x3b   : > { %p1566_p0 = pnand %p1564_p13, %p1552_p2  ;;  %s1568_s15 = sshll.u32 %s1668_s17, 4  ;;  %s1569_s15 = int_to_ptr.vmem [resolvable:$false] %s1568_s15 }
  0x3c   : > { %s1570_s20 = scalar_lea.vmem %s1569_s15, 512  ;;  %p1571_p10 = scmp.lt.s32.totalorder %s300_s4, %s1569_s15 }
  0x3d   : > { %p1567_p5 = pneg %p1566_p0  ;;  %p1572_p1 = scmp.lt.s32.totalorder %s1570_s20, %s1563_s19 }
  0x3f   : > { %p1573_p4 = por %p1572_p1, %p1571_p10 }
  0x41   : > { %p1574_p6 = pnand %p1573_p4, %p1567_p5 }
  0x43   : > { %1577 = shalt.err (!%p1574_p6)
}
  0x44   : > { %s1669_s18 = smov 128   ;;  %s1670_s23 = smov 8  }
  0x45   : > { %1400 = dma.hbm_to_vmem [thread:$0]  (!%p1826_p11), %s298_s8, 256, %s300_s4, %s288_s5, %s1669_s18, %s1669_s18, %s1670_s23  }
  0x46   : > { %329 = sbr.rel (%p1769_p8) target bundleno = 568 (0x238), region = 48  ;;  %s1837_s22 = sand.u32 (!%p1769_p8), 1, %s1646_s25  }
  0x47   : > { %s1171_s30 = sshll.u32 (!%p1769_p8), %s1837_s22, 4  ;;  %s332_s15 = scalar_lea.sflag (!%p1769_p8), [#allocation4], %s1837_s22 }
  0x48   : > { %s1841_s14 = scalar_lea.vmem (!%p1769_p8), [#allocation3], %s1171_s30  ;;  %p2030_p12 = scmp.ne.s32.totalorder (!%p1769_p8), %s2021_s11, 0 }
  0x4b   : > { %1629 = dma.done.wait (%p2030_p12), %s332_s15, 256  }
  0x4c   : > { %1631 = vsyncadd (%p2030_p12), %s332_s15, 4294967040  ;;  %p2031_p3 = scmp.ne.s32.totalorder %s2019_s9, 0 }
  0x4e   : > { %1633 = dma.done.wait (%p2031_p3), [#allocation7], 2048  }
  0x4f   : > { %1635 = vsyncadd (%p2031_p3), [#allocation7], 4294965248  ;;  %s1175_s4 = sshll.u32 %s1654_s27, 3  ;;  %v1671_v0 = vmov 0   ;;  %v1470_v1 = vld [vmem:[%s2006_s1 + $0x38] sm:$0xff]   ;;  %v1471_v2 = vld [vmem:[%s2006_s1 + $0x30] sm:$0xff]  }
  0x50   : > { %1468 = vset.pattern.permute.xlu0 %v1671_v0  ;;  %1469 = vset.pattern.permute.xlu1 %v1671_v0  ;;  %p397_p8 = scmp.lt.s32.totalorder %s1175_s4, 15  ;;  %v1472_v3 = vld [vmem:[%s2006_s1 + $0x28] sm:$0xff]   ;;  %v1473_v4 = vld [vmem:[%s2006_s1 + $0x20] sm:$0xff]   ;;  %v1474_v9 = vld [vmem:[%s2006_s1 + $0x18] sm:$0xff]   ;;  %s1174_s30 = sshll.u32 %s1837_s22, 5 }
  0x51   : > { %1290 = vmatprep.subr.bf16.mxu0 %v1470_v1  ;;  %v430_v5 = vld [vmem:[%s1841_s14] sm:$0xff]  ;;  %v1478_v12 = vld [vmem:[#allocation6 + $0x38] sm:$0xff]   ;;  %v1482_v17 = vld [vmem:[#allocation6 + $0x28] sm:$0xff]   ;;  %s1944_s15 = scalar_lea.vmem [#allocation9], %s1174_s30  ;;  %s1230_s13 = sshll.u32 %s1654_s27, 9 }
  0x52   : > { %s2043_s4 = smov (!%p397_p8, %s1175_s4), 15  ;;  %1291 = vmatpush3.bf16.msra.mxu0 %v1470_v1  ;;  %v432_v7 = vunpack.c.l.s8.bf16 %v430_v5  ;;  %v1475_v14 = vld [vmem:[%s2006_s1 + $0x10] sm:$0xff]   ;;  %1314 = vmatprep.subr.bf16.mxu1 %v1478_v12  ;;  %v1476_v18 = vld [vmem:[%s2006_s1 + $0x8] sm:$0xff]   ;;  %v1484_v21 = vld [vmem:[#allocation6 + $0x20] sm:$0xff]   ;;  %v433_v27 = vunpack.c.h.s8.bf16 %v430_v5  ;;  %s1019_s5 = sshll.u32 %s1944_s15, 4  ;;  %s1950_s5 = int_to_ptr.vmem [resolvable:$true] %s1019_s5 }
  0x53   : > { %s1178_s9 = sshll.u32 %s2043_s4, 3  ;;  %1292 = vmatprep.subr.bf16.mxu0 %v1471_v2  ;;  %v1480_v15 = vld [vmem:[#allocation6 + $0x30] sm:$0xff]   ;;  %1315 = vmatpush3.bf16.msra.mxu1 %v1478_v12  ;;  %v1477_v22 = vld [vmem:[%s2006_s1] sm:$0xff]   ;;  %v1486_v23 = vld [vmem:[#allocation6 + $0x18] sm:$0xff]   ;;  %s1006_s10 = scalar_lea.sflag [#allocation5], %s1837_s22 }
  0x54   : > { %s1867_s18 = scalar_lea.vmem %s2008_s3, %s1178_s9  ;;  %1306 = vmatprep.mubr.bf16.mxu0 %v432_v7  ;;  %1316 = vmatprep.subr.bf16.mxu1 %v1480_v15  ;;  %v431_v24 = vld [vmem:[%s1841_s14 + $0x8] sm:$0xff]  ;;  %v1488_v26 = vld [vmem:[#allocation6 + $0x10] sm:$0xff]   ;;  %v1905_v32 = vld [vmem:[#allocation8 + $0x20] sm:$0xff]   ;;  %s1176_s14 = sshll.u32 %s2043_s4, 2 }
  0x55   : > { %v592_v6 = vld [vmem:[%s1867_s18] sm:$0xff]  ;;  %v594_v8 = vld [vmem:[%s1867_s18 + $0x10] sm:$0xff]  ;;  %v593_v10 = vld [vmem:[%s1867_s18 + $0x8] sm:$0xff]  ;;  %v434_v28 = vunpack.c.l.s8.bf16 %v431_v24  ;;  %v435_v31 = vunpack.c.h.s8.bf16 %v431_v24  ;;  %s1955_s9 = scalar_lea.hbm %s2012_s7, %s1230_s13  ;;  %s1578_s19 = scalar_lea.vmem %s1950_s5, 512 }
  0x56   : > { %1293 = vmatpush3.bf16.msra.mxu0 %v1471_v2  ;;  %602 = vperm.xlu0 %1468, %v592_v6   ;;  %v595_v11 = vld [vmem:[%s1867_s18 + $0x18] sm:$0xff]  ;;  %v596_v13 = vld [vmem:[%s1867_s18 + $0x20] sm:$0xff]  ;;  %v597_v16 = vld [vmem:[%s1867_s18 + $0x28] sm:$0xff]  ;;  %p1579_p9 = scmp.ne.s32.totalorder %s1950_s5, %s1578_s19  ;;  %s1672_s27 = smov [#allocation9]  }
  0x57   : > { %1294 = vmatprep.subr.bf16.mxu0 %v1472_v3  ;;  %612 = vperm.xlu1 %1469, %v594_v8   ;;  %v598_v19 = vld [vmem:[%s1867_s18 + $0x30] sm:$0xff]  ;;  %v599_v20 = vld [vmem:[%s1867_s18 + $0x38] sm:$0xff]  ;;  %v1901_v30 = vld [vmem:[#allocation8 + $0x28] sm:$0xff]   ;;  %s1923_s18 = scalar_lea.vmem %s2007_s2, %s1176_s14  ;;  %s1582_s14 = sshll.u32 %s1672_s27, 4  ;;  %s1583_s14 = int_to_ptr.vmem [resolvable:$false] %s1582_s14 }
  0x58   : > { %1317 = vmatpush3.bf16.msra.mxu1 %v1480_v15  ;;  %v1894_v25 = vld [vmem:[#allocation8 + $0x38] sm:$0xff]   ;;  %v1897_v29 = vld [vmem:[#allocation8 + $0x30] sm:$0xff]   ;;  %v1490_v35 = vld [vmem:[#allocation6 + $0x8] sm:$0xff]   ;;  %p1580_p11 = pnand %p1579_p9, %p1810_p7  ;;  %s1584_s17 = scalar_lea.vmem %s1583_s14, 1024 }
  0x59   : > { %1318 = vmatprep.subr.bf16.mxu1 %v1482_v17  ;;  %v1909_v33 = vld [vmem:[#allocation8 + $0x18] sm:$0xff]   ;;  %v1914_v34 = vld [vmem:[#allocation8 + $0x10] sm:$0xff]   ;;  %v1491_v36 = vld [vmem:[#allocation8 + $0x8] sm:$0xff]   ;;  %p1585_p13 = scmp.lt.s32.totalorder %s1950_s5, %s1583_s14  ;;  %p1586_p0 = scmp.lt.s32.totalorder %s1584_s17, %s1578_s19 }
  0x5a   : > { %1295 = vmatpush3.bf16.msra.mxu0 %v1472_v3  ;;  %607 = vperm.xlu0 %1468, %v593_v10   ;;  %v1492_v37 = vld [vmem:[#allocation6] sm:$0xff]   ;;  %v1495_v40 = vld [vmem:[%s1923_s18 + $0x8] sm:$0xff]   ;;  %v1497_v6 = vld [vmem:[%s1923_s18 + $0x18] sm:$0xff]   ;;  %p1581_p2 = pneg %p1580_p11 }
  0x5b   : > { %1296 = vmatprep.subr.bf16.mxu0 %v1473_v4  ;;  %617 = vperm.xlu1 %1469, %v595_v11   ;;  %v1493_v38 = vld [vmem:[#allocation8] sm:$0xff]   ;;  %p1587_p5 = por %p1586_p0, %p1585_p13 }
  0x5c   : > { %1319 = vmatpush3.bf16.msra.mxu1 %v1482_v17  ;;  %v1494_v39 = vld [vmem:[%s1923_s18] sm:$0xff]  }
  0x5d   : > { %1320 = vmatprep.subr.bf16.mxu1 %v1484_v21  ;;  %v1187_v8 = vld [vmem:[%s2011_s6] ss:$0 sm:$0xff]  ;;  %p1588_p10 = pnand %p1587_p5, %p1581_p2 }
  0x5e   : > { %1297 = vmatpush3.bf16.msra.mxu0 %v1473_v4  ;;  %622 = vperm.xlu0 %1468, %v596_v13   ;;  %v1496_v4 = vld [vmem:[%s1923_s18 + $0x10] sm:$0xff]  }
  0x5f   : > { %1298 = vmatprep.subr.bf16.mxu0 %v1474_v9  ;;  %627 = vperm.xlu1 %1469, %v597_v16  }
  0x60   : > { %1321 = vmatpush3.bf16.msra.mxu1 %v1484_v21 }
  0x61   : > { %1322 = vmatprep.subr.bf16.mxu1 %v1486_v23 }
  0x62   : > { %1299 = vmatpush3.bf16.msra.mxu0 %v1474_v9  ;;  %632 = vperm.xlu0 %1468, %v598_v19  }
  0x63   : > { %1300 = vmatprep.subr.bf16.mxu0 %v1475_v14  ;;  %637 = vperm.xlu1 %1469, %v599_v20  }
  0x64   : > { %1323 = vmatpush3.bf16.msra.mxu1 %v1486_v23 }
  0x65   : > { %1324 = vmatprep.subr.bf16.mxu1 %v1488_v26 }
  0x66   : > { %1301 = vmatpush3.bf16.msra.mxu0 %v1475_v14 }
  0x67   : > { %1302 = vmatprep.subr.bf16.mxu0 %v1476_v18 }
  0x68   : > { %1325 = vmatpush3.bf16.msra.mxu1 %v1488_v26 }
  0x69   : > { %1326 = vmatprep.subr.bf16.mxu1 %v1490_v35 }
  0x6a   : > { %1303 = vmatpush3.bf16.msra.mxu0 %v1476_v18 }
  0x6b   : > { %1304 = vmatprep.subr.bf16.mxu0 %v1477_v22 }
  0x6c   : > { %1327 = vmatpush3.bf16.msra.mxu1 %v1490_v35 }
  0x6d   : > { %1328 = vmatprep.subr.bf16.mxu1 %v1492_v37 }
  0x6e   : > { %1305 = vmatpush3.bf16.msra.mxu0 %v1477_v22 }
  0x6f   : > { %1338 = vmatprep.subr.bf16.mxu0 %v1894_v25 }
  0x70   : > { %1329 = vmatpush3.bf16.msra.mxu1 %v1492_v37 }
  0x71   : > { %1307 = vmatmul.mubr.bf16.vlgmr.msra.gmra.mxu0 %v433_v27  ;;  %1362 = vmatprep.subr.bf16.mxu1 %v1894_v25 }
  0x72   : > { %1310 = vmatprep.mubr.bf16.mxu0 %v434_v28  ;;  %1339 = vmatpush3.bf16.msra.mxu0 %v1894_v25 }
  0x73   : > { %1340 = vmatprep.subr.bf16.mxu0 %v1897_v29 }
  0x76   : > { %1341 = vmatpush3.bf16.msra.mxu0 %v1897_v29 }
  0x77   : > { %1342 = vmatprep.subr.bf16.mxu0 %v1901_v30 }
  0x79   : > { %1311 = vmatmul.mubr.bf16.gmra.mxu0 %v435_v31 }
  0x7a   : > { %1343 = vmatpush3.bf16.msra.mxu0 %v1901_v30  ;;  %1354 = vmatprep.mubr.bf16.mxu0 %v1494_v39 }
  0x7b   : > { %1344 = vmatprep.subr.bf16.mxu0 %v1905_v32 }
  0x7e   : > { %1345 = vmatpush3.bf16.msra.mxu0 %v1905_v32 }
  0x7f   : > { %1346 = vmatprep.subr.bf16.mxu0 %v1909_v33 }
  0x82   : > { %1347 = vmatpush3.bf16.msra.mxu0 %v1909_v33 }
  0x83   : > { %1348 = vmatprep.subr.bf16.mxu0 %v1914_v34 }
  0x86   : > { %1349 = vmatpush3.bf16.msra.mxu0 %v1914_v34 }
  0x87   : > { %1350 = vmatprep.subr.bf16.mxu0 %v1491_v36 }
  0x8a   : > { %1351 = vmatpush3.bf16.msra.mxu0 %v1491_v36 }
  0x8b   : > { %1352 = vmatprep.subr.bf16.mxu0 %v1493_v38 }
  0x8e   : > { %1353 = vmatpush3.bf16.msra.mxu0 %v1493_v38 }
  0x91   : > { %1355 = vmatmul.mubr.bf16.vlgmr.msra.gmra.mxu0 %v1495_v40 }
  0xd1   : > { %v603_v42 = vpop.permute.xlu0 %602 }
  0xd2   : > { %v613_v41 = vpop.permute.xlu1 %612 }
  0xd5   : > { %v608_v46 = vpop.permute.xlu0 %607 }
  0xd6   : > { %v618_v44 = vpop.permute.xlu1 %617 }
  0xd9   : > { %v623_v55 = vpop.permute.xlu0 %622 }
  0xda   : > { %v628_v50 = vpop.permute.xlu1 %627 }
  0xdd   : > { %v633_v63 = vpop.permute.xlu0 %632 }
  0xde   : > { %v638_v60 = vpop.permute.xlu1 %637 }
 0x131   : > { %v1308_v43 = vpop.f32.mrf.mxu0 }
 0x132   : > { %v642_v53 = vmul.f32 %v1308_v43, %v613_v41 }
 0x133   : > { %v534_v45 = vpop.f32.mrf.mxu0 }
 0x134   : > { %v640_v51 = vmul.f32 %v603_v42, %v534_v45 }
 0x135   : > { %v1309_v47 = vpop.f32.mrf.mxu0 }
 0x136   : > { %v643_v48 = vmul.f32 %v1309_v47, %v618_v44 }
 0x137   : > { %v537_v49 = vpop.f32.mrf.mxu0 }
 0x138   : > { %v641_v52 = vmul.f32 %v608_v46, %v537_v49  ;;  %v649_v57 = vpack.c.bf16 %v643_v48, %v642_v53 }
 0x139   : > { %v1312_v54 = vpop.f32.mrf.mxu0 }
 0x13a   : > { %v648_v56 = vpack.c.bf16 %v641_v52, %v640_v51  ;;  %v646_v2 = vmul.f32 %v1312_v54, %v633_v63 }
 0x13b   : > { %v550_v58 = vpop.f32.mrf.mxu0 }
 0x13c   : > { %1330 = vmatprep.mubr.bf16.mxu1 %v648_v56  ;;  %v644_v0 = vmul.f32 %v623_v55, %v550_v58 }
 0x13d   : > { %v1313_v59 = vpop.f32.mrf.mxu0  ;;  %1331 = vmatmul.mubr.bf16.vlgmr.msra.gmra.mxu1 %v649_v57 }
 0x13e   : > { %1370 = vmatpush3.bf16.msra.mxu1 %v1894_v25  ;;  %v647_v61 = vmul.f32 %v1313_v59, %v638_v60 }
 0x13f   : > { %v553_v62 = vpop.f32.mrf.mxu0  ;;  %1363 = vmatprep.subr.bf16.mxu1 %v1897_v29 }
 0x140   : > { %v645_v1 = vmul.f32 %v628_v50, %v553_v62  ;;  %v651_v5 = vpack.c.bf16 %v647_v61, %v646_v2 }
 0x142   : > { %v650_v3 = vpack.c.bf16 %v645_v1, %v644_v0  ;;  %1371 = vmatpush3.bf16.msra.mxu1 %v1897_v29 }
 0x143   : > { %1364 = vmatprep.subr.bf16.mxu1 %v1901_v30 }
 0x144   : > { %1334 = vmatprep.mubr.bf16.mxu1 %v650_v3 }
 0x145   : > { %1335 = vmatmul.mubr.bf16.gmra.mxu1 %v651_v5 }
 0x146   : > { %1372 = vmatpush3.bf16.msra.mxu1 %v1901_v30  ;;  %1358 = vmatprep.mubr.bf16.mxu1 %v1496_v4 }
 0x147   : > { %1365 = vmatprep.subr.bf16.mxu1 %v1905_v32 }
 0x14a   : > { %1373 = vmatpush3.bf16.msra.mxu1 %v1905_v32 }
 0x14b   : > { %1366 = vmatprep.subr.bf16.mxu1 %v1909_v33 }
 0x14e   : > { %1374 = vmatpush3.bf16.msra.mxu1 %v1909_v33 }
 0x14f   : > { %1367 = vmatprep.subr.bf16.mxu1 %v1914_v34 }
 0x151   : > { %v1356_v7 = vpop.f32.mrf.mxu0 }
 0x152   : > { %1375 = vmatpush3.bf16.msra.mxu1 %v1914_v34 }
 0x153   : > { %1368 = vmatprep.subr.bf16.mxu1 %v1491_v36  ;;  %v918_v9 = vpop.f32.mrf.mxu0 }
 0x155   : > { %v1357_v13 = vpop.f32.mrf.mxu0 }
 0x156   : > { %1376 = vmatpush3.bf16.msra.mxu1 %v1491_v36 }
 0x157   : > { %1369 = vmatprep.subr.bf16.mxu1 %v1493_v38  ;;  %v921_v19 = vpop.f32.mrf.mxu0 }
 0x15a   : > { %1377 = vmatpush3.bf16.msra.mxu1 %v1493_v38 }
 0x15d   : > { %1359 = vmatmul.mubr.bf16.vlgmr.msra.gmra.mxu1 %v1497_v6 }
 0x1fd   : > { %v1332_v10 = vpop.f32.mrf.mxu1 }
 0x1fe   : > { %v766_v11 = vadd.f32 %v1332_v10, %v1187_v8 }
 0x1ff   : > { %v757_v12 = vpop.f32.mrf.mxu1 }
 0x200   : > { %v758_v14 = vadd.f32 %v1187_v8, %v757_v12  ;;  %v951_v16 = vadd.f32 %v1356_v7, %v766_v11 }
 0x201   : > { %v1333_v15 = vpop.f32.mrf.mxu1 }
 0x202   : > { %v769_v17 = vadd.f32 %v1333_v15, %v1187_v8  ;;  %v949_v20 = vadd.f32 %v918_v9, %v758_v14  ;;  %v959_v23 = vmax.f32 %v951_v16, 0.0 }
 0x203   : > { %v760_v18 = vpop.f32.mrf.mxu1 }
 0x204   : > { %v761_v21 = vadd.f32 %v1187_v8, %v760_v18  ;;  %v952_v22 = vadd.f32 %v1357_v13, %v769_v17  ;;  %v957_v26 = vmax.f32 %v949_v20, 0.0 }
 0x205   : > { %v1336_v30 = vpop.f32.mrf.mxu1 }
 0x206   : > { %v960_v24 = vmax.f32 %v952_v22, 0.0  ;;  %v950_v25 = vadd.f32 %v921_v19, %v761_v21  ;;  %v782_v35 = vadd.f32 %v1336_v30, %v1187_v8 }
 0x207   : > { %v773_v31 = vpop.f32.mrf.mxu1 }
 0x208   : > { %v1239_v27 = vpack.c.bf16 %v960_v24, %v959_v23  ;;  %v958_v28 = vmax.f32 %v950_v25, 0.0  ;;  %v774_v37 = vadd.f32 %v1187_v8, %v773_v31 }
 0x209   : > { %v1337_v32 = vpop.f32.mrf.mxu1 }
 0x20a   : > { %1251 = vst [vmem:[%s1944_s15 + $0x8] sm:$0xff] %v1239_v27   ;;  %v1234_v29 = vpack.c.bf16 %v958_v28, %v957_v26  ;;  %v785_v38 = vadd.f32 %v1337_v32, %v1187_v8 }
 0x20b   : > { %v776_v33 = vpop.f32.mrf.mxu1 }
 0x20c   : > { %1235 = vst [vmem:[%s1944_s15] sm:$0xff] %v1234_v29   ;;  %v777_v41 = vadd.f32 %v1187_v8, %v776_v33 }
 0x21d   : > { %v1360_v34 = vpop.f32.mrf.mxu1 }
 0x21e   : > { %v955_v39 = vadd.f32 %v1360_v34, %v782_v35 }
 0x21f   : > { %v934_v36 = vpop.f32.mrf.mxu1 }
 0x220   : > { %v953_v42 = vadd.f32 %v934_v36, %v774_v37  ;;  %v963_v45 = vmax.f32 %v955_v39, 0.0 }
 0x221   : > { %v1361_v40 = vpop.f32.mrf.mxu1 }
 0x222   : > { %v956_v43 = vadd.f32 %v1361_v40, %v785_v38  ;;  %v961_v48 = vmax.f32 %v953_v42, 0.0 }
 0x223   : > { %v937_v44 = vpop.f32.mrf.mxu1 }
 0x224   : > { %v964_v46 = vmax.f32 %v956_v43, 0.0  ;;  %v954_v47 = vadd.f32 %v937_v44, %v777_v41 }
 0x226   : > { %v1249_v49 = vpack.c.bf16 %v964_v46, %v963_v45  ;;  %v962_v50 = vmax.f32 %v954_v47, 0.0 }
 0x228   : > { %1253 = vst [vmem:[%s1944_s15 + $0x18] sm:$0xff] %v1249_v49   ;;  %v1244_v51 = vpack.c.bf16 %v962_v50, %v961_v48 }
 0x22a   : > { %1252 = vst [vmem:[%s1944_s15 + $0x10] sm:$0xff] %v1244_v51  }
 0x22b   : > { %1591 = shalt.err (!%p1588_p10)
}
 0x22c   : > { %s1592_s20 = scalar_lea.hbm %s1955_s9, 512  ;;  %s1596_s23 = scalar_lea.hbm %s2012_s7, 1024 }
 0x22d   : > { %p1593_p1 = scmp.ne.s32.totalorder %s1955_s9, %s1592_s20  ;;  %p1597_p12 = scmp.lt.s32.totalorder %s1955_s9, %s2012_s7 }
 0x22e   : > { %p1598_p3 = scmp.lt.s32.totalorder %s1596_s23, %s1592_s20 }
 0x22f   : > { %p1594_p4 = pnand %p1593_p1, %p1810_p7 }
 0x230   : > { %p1599_p8 = por %p1598_p3, %p1597_p12 }
 0x231   : > { %p1595_p6 = pneg %p1594_p4 }
 0x233   : > { %p1600_p9 = pnand %p1599_p8, %p1595_p6 }
 0x235   : > { %1603 = shalt.err (!%p1600_p9)
}
 0x236   : > { %s1673_s13 = smov 64   ;;  %s1674_s11 = smov 4  }
 0x237   : > { %1388 = dma.vmem_to_hbm [thread:$0]  (%p1810_p7), %s1950_s5, 512, %s1955_s9, %s1006_s10, %s1673_s13, %s1673_s13, %s1674_s11  }
 0x238 PF: > { %s1034_s8 = sand.u32 1, %s1642_s24   ;;  %p2032_p11 = scmp.ne.s32.totalorder %s2022_s12, 0 }
 0x239   : > { %p2033_p2 = scmp.ge.s32.totalorder %s1662_s29, 2  ;;  %s1035_s19 = scalar_lea.sflag [#allocation5], %s1034_s8 }
 0x23b   : > { %p1402_p13 = pnand %p2033_p2, %p2032_p11 }
 0x23d   : > { %p1403_p0 = pneg %p1402_p13 }
 0x23f   : > { %1637 = dma.done.wait (%p1403_p0), %s1035_s19, 512  }
 0x240   : > { %1639 = vsyncadd (%p1403_p0), %s1035_s19, 4294966784  ;;  %s24_s29 = sadd.s32 1, %s1662_s29   ;;  %s2034_s16 = sld [smem:[#allocation13_spill]] }
 0x241   : > { %p21_p5 = scmp.ge.s32.totalorder %s24_s29, 4   ;;  %s2035_s24 = smov %s1646_s25 }
 0x242   : > { %s2036_s25 = smov %s1650_s26  ;;  %s2037_s26 = smov %s1819_s21 }
 0x243   : > { %s2038_s27 = smov %s1658_s28  ;;  %23 = sbr.rel (!%p21_p5) target bundleno = 10 (0xa), region = 118 }
 0x246   : > { %s2039_s28 = smov %s2034_s16 }
 0x248   :  { %1040 = vsyncpa [#allocation4], 1 }
 0x249   :  { %1042 = vsyncpa [#allocation4 + $0x1], 1 }
 0x24a   :  { %1043 = vsyncpa [#allocation7], 1 }
 0x24b   :  { %1044 = vsyncpa [#allocation5], 1 }
 0x24c   :  { %1046 = vsyncpa [#allocation5 + $0x1], 1 }

</bundles_post_ra>
